<compile_context>
chip_gen: v5e
topology: v5e:2x2
jax: 0.10.0
libtpu: 0.0.40
codegen_flags: <defaults>
</compile_context>

<pallas_src>
import jax
import jax.numpy as jnp
from jax.experimental import pallas as pl
from jax.experimental.pallas import tpu as pltpu


def _round_up(a, m):
    return ((a + m - 1) // m) * m


def _transpose_kernel(x_ref, o_ref):
    # x_ref: (C, tN) tile of [B, C, N] (batch dim squeezed)
    # o_ref: (tN, C) tile of [B, N, C] (batch dim squeezed)
    o_ref[...] = x_ref[...].T  # 2-D transpose -> XLU vxpose


def _transpose_flat_kernel(x_ref, o_ref):
    # x_ref: (C, tN); o_ref: (tN*C // 128, 128) lane-dense flat slab.
    # Row-major flatten of the (tN, C) transpose == the [n, c] interleave.
    o_ref[...] = x_ref[...].T.reshape(o_ref.shape)


def _vmem_budget():
    """(block_budget_bytes, vmem_limit_bytes) derived from the actual chip."""
    phys = None
    try:
        phys = getattr(pltpu.get_tpu_info(), "vmem_capacity_bytes", None)
    except Exception:
        phys = None
    if not phys:
        phys = 64 * 1024 * 1024      # conservative default (v7x per-TC VMEM)
    vmem_limit = (int(phys) * 3) // 4  # ~96 MiB on v5e/v6e, ~48 MiB on v7x
    block_budget = vmem_limit // 2     # ~48 MiB on v5e/v6e, ~24 MiB on v7x
    return int(block_budget), int(vmem_limit)


def _pick_tile_n(N, C, itemsize, block_budget, lane_dense):
    """Largest 128-multiple N-tile whose double-buffered, padding-aware
    in+out footprint (plus the transposed temporary) fits block_budget."""
    if N <= 128:
        return N  # full-dim block is always legal
    c_in = _round_up(C, 8)                            # (C, tN) sublane padding
    c_out = C if lane_dense else _round_up(C, 128)    # (tN, C) lane padding
    bytes_per_n = itemsize * (2 * c_in + 3 * c_out)   # 2x in, 2x out, 1x temp
    max_tn = max(128, block_budget // max(1, bytes_per_n))
    tile_n = min(N, max_tn, 16384)   # HBM roofline saturates well before 16K
    return max(128, (tile_n // 128) * 128)


def _grid_for(B, N, tile_n):
    n_tiles = pl.cdiv(N, tile_n)
    # Guarantee >= 2 grid steps so both v7x TensorCores get DMA work.
    if B == 1 and n_tiles == 1 and N > 128:
        tile_n = max(128, _round_up(pl.cdiv(N, 2), 128))
        n_tiles = pl.cdiv(N, tile_n)
    return tile_n, n_tiles


def _make_call(B, C, N, dtype, tile_n, n_tiles, vmem_limit, lane_dense):
    # None squeezes the batch dim -> kernel sees clean 2-D refs.
    in_spec = pl.BlockSpec((None, C, tile_n), lambda b, n: (b, 0, n))
    if lane_dense:
        rows_total = (N * C) // 128
        rows_tile = (tile_n * C) // 128
        out_shape = jax.ShapeDtypeStruct((B, rows_total, 128), dtype)
        out_spec = pl.BlockSpec((None, rows_tile, 128), lambda b, n: (b, n, 0))
        kernel = _transpose_flat_kernel
    else:
        out_shape = jax.ShapeDtypeStruct((B, N, C), dtype)
        out_spec = pl.BlockSpec((None, tile_n, C), lambda b, n: (b, n, 0))
        kernel = _transpose_kernel
    return pl.pallas_call(
        kernel,
        out_shape=out_shape,
        grid=(B, n_tiles),
        in_specs=[in_spec],
        out_specs=out_spec,
        compiler_params=pltpu.CompilerParams(
            # Both axes independent -> megacore sharding on v7x.
            dimension_semantics=("parallel", "parallel"),
            vmem_limit_bytes=vmem_limit,
        ),
    )


def patch_embed(x):
    """x: [B, C, H, W]  ->  [B, H*W, C]  (matches PatchEmbed.forward)."""
    B, C, H, W = x.shape
    N = H * W
    x_flat = x.reshape(B, C, N)  # free row-major view, no data movement
    itemsize = jnp.dtype(x.dtype).itemsize
    block_budget, vmem_limit = _vmem_budget()

    # Lane-dense flat-output path for small C: output last dim is 128 instead
    # of C, so every store is an unmasked full-lane vst.  C % 128 == 0 is
    # already lane-dense with the plain (tile_n, C) layout, so keep that.
    lane_dense_ok = (C < 128) and ((N * C) % 128 == 0)

    if lane_dense_ok:
        tile_n = _pick_tile_n(N, C, itemsize, block_budget, lane_dense=True)
        tile_n, n_tiles = _grid_for(B, N, tile_n)
        try:
            y = _make_call(B, C, N, x.dtype, tile_n, n_tiles, vmem_limit,
                           lane_dense=True)(x_flat)
            return y.reshape(B, N, C)  # free reshape of the flat slab
        except Exception:
            # TODO(synk): some Mosaic versions cannot lower the in-kernel
            # (tN, C) -> (tN*C/128, 128) fold; fall back to the plain layout
            # (production answer for tiny C is fusion into the projection).
            pass

    tile_n = _pick_tile_n(N, C, itemsize, block_budget, lane_dense=False)
    tile_n, n_tiles = _grid_for(B, N, tile_n)
    return _make_call(B, C, N, x.dtype, tile_n, n_tiles, vmem_limit,
                      lane_dense=False)(x_flat)


if __name__ == "__main__":
    key = jax.random.PRNGKey(0)
    B, C, H, W = 2, 4, 16, 16
    x = jax.random.normal(key, (B, C, H, W), dtype=jnp.float32)

    y = patch_embed(x)
    y = jax.block_until_ready(y)

    # Reference semantics: x.flatten(2).transpose(1, 2)
    y_ref = jnp.transpose(x.reshape(B, C, H * W), (0, 2, 1))

    assert y.shape == (B, H * W, C), y.shape
    assert y.dtype == x.dtype
    assert jnp.array_equal(y, y_ref), "mismatch vs reference"

    print("KERNEL_OK")
</pallas_src>

<mosaic_0001>
module attributes {stable_mosaic.version = 11 : i64} {
  func.func @_transpose_flat_kernel(%arg0: i32, %arg1: i32, %arg2: memref<1x4x256xf32, #tpu.memory_space<vmem>>, %arg3: memref<1x8x128xf32, #tpu.memory_space<vmem>>) attributes {dimension_semantics = [#tpu.dimension_semantics<parallel>, #tpu.dimension_semantics<parallel>], iteration_bounds = array<i64: 2, 1>, scalar_prefetch = 0 : i64, scratch_operands = 0 : i64, tpu.core_type = #tpu.core_type<tc>, window_params = [{transform_indices = @transform_0, window_bounds = array<i64: 1, 4, 256>}, {transform_indices = @transform_1, window_bounds = array<i64: 1, 8, 128>}]} {
    %c0 = arith.constant 0 : index
    %c0_0 = arith.constant 0 : index
    %c0_1 = arith.constant 0 : index
    %0 = vector.load %arg2[%c0, %c0_0, %c0_1] : memref<1x4x256xf32, #tpu.memory_space<vmem>>, vector<1x4x256xf32>
    %1 = vector.shape_cast %0 : vector<1x4x256xf32> to vector<4x256xf32>
    %2 = tpu.transpose %1, [1, 0] : vector<4x256xf32> -> vector<256x4xf32>
    %3 = vector.shape_cast %2 : vector<256x4xf32> to vector<8x128xf32>
    %c0_2 = arith.constant 0 : index
    %c0_3 = arith.constant 0 : index
    %c0_4 = arith.constant 0 : index
    %4 = vector.load %arg3[%c0_2, %c0_3, %c0_4] : memref<1x8x128xf32, #tpu.memory_space<vmem>>, vector<1x8x128xf32>
    %5 = vector.shape_cast %4 : vector<1x8x128xf32> to vector<8x128xf32>
    %6 = vector.shape_cast %3 : vector<8x128xf32> to vector<1x8x128xf32>
    tpu.vector_store %arg3[%c0_2, %c0_3, %c0_4], %6 {strides = array<i32>} : memref<1x8x128xf32, #tpu.memory_space<vmem>>, vector<1x8x128xf32>,
    return
  }
  func.func @transform_0(%arg0: i32, %arg1: i32) -> (i32, i32, i32) {
    %c0_i32 = arith.constant 0 : i32
    %c0_i32_0 = arith.constant 0 : i32
    return %arg0, %c0_i32, %arg1 : i32, i32, i32
  }
  func.func @transform_1(%arg0: i32, %arg1: i32) -> (i32, i32, i32) {
    %c0_i32 = arith.constant 0 : i32
    %c0_i32_0 = arith.constant 0 : i32
    return %arg0, %arg1, %c0_i32 : i32, i32, i32
  }
}

module attributes {stable_mosaic.version = 11 : i64} {
  func.func @_transpose_kernel(%arg0: i32, %arg1: i32, %arg2: memref<1x4x256xf32, #tpu.memory_space<vmem>>, %arg3: memref<1x256x4xf32, #tpu.memory_space<vmem>>) attributes {dimension_semantics = [#tpu.dimension_semantics<parallel>, #tpu.dimension_semantics<parallel>], iteration_bounds = array<i64: 2, 1>, scalar_prefetch = 0 : i64, scratch_operands = 0 : i64, tpu.core_type = #tpu.core_type<tc>, window_params = [{transform_indices = @transform_0, window_bounds = array<i64: 1, 4, 256>}, {transform_indices = @transform_1, window_bounds = array<i64: 1, 256, 4>}]} {
    %c0 = arith.constant 0 : index
    %c0_0 = arith.constant 0 : index
    %c0_1 = arith.constant 0 : index
    %0 = vector.load %arg2[%c0, %c0_0, %c0_1] : memref<1x4x256xf32, #tpu.memory_space<vmem>>, vector<1x4x256xf32>
    %1 = vector.shape_cast %0 : vector<1x4x256xf32> to vector<4x256xf32>
    %2 = tpu.transpose %1, [1, 0] : vector<4x256xf32> -> vector<256x4xf32>
    %c0_2 = arith.constant 0 : index
    %c0_3 = arith.constant 0 : index
    %c0_4 = arith.constant 0 : index
    %3 = vector.load %arg3[%c0_2, %c0_3, %c0_4] : memref<1x256x4xf32, #tpu.memory_space<vmem>>, vector<1x256x4xf32>
    %4 = vector.shape_cast %3 : vector<1x256x4xf32> to vector<256x4xf32>
    %5 = vector.shape_cast %2 : vector<256x4xf32> to vector<1x256x4xf32>
    tpu.vector_store %arg3[%c0_2, %c0_3, %c0_4], %5 {strides = array<i32>} : memref<1x256x4xf32, #tpu.memory_space<vmem>>, vector<1x256x4xf32>,
    return
  }
  func.func @transform_0(%arg0: i32, %arg1: i32) -> (i32, i32, i32) {
    %c0_i32 = arith.constant 0 : i32
    %c0_i32_0 = arith.constant 0 : i32
    return %arg0, %c0_i32, %arg1 : i32, i32, i32
  }
  func.func @transform_1(%arg0: i32, %arg1: i32) -> (i32, i32, i32) {
    %c0_i32 = arith.constant 0 : i32
    %c0_i32_0 = arith.constant 0 : i32
    return %arg0, %arg1, %c0_i32 : i32, i32, i32
  }
}

</mosaic_0001>

<bundles_post_ra>
// kernel: tpu_custom_call.1
= control target key start
LH: loop header
LB: loop body
LE: loop exit
PB: predicated region body
PF: predicated region fallthrough
CT: control target
= control target key end

     0   :  { %6 = vsyncpa [#allocation3], 0  ;;  %s681_s0 = inlined_call_operand.hbm [shape: f32[2,4,256], index: 0, kind: input, shape index: {}]   ;;  %s682_s1 = inlined_call_operand.vmem [shape: f32[2,256,4], index: 1, kind: output, shape index: {}]  }
   0x1   :  { %8 = vsyncpa [#allocation3 + $0x1], 0  ;;  %s527_s6 = smov 0   ;;  %s529_s7 = smov 0  }
   0x2   :  { %s531_s8 = smov 0   ;;  %s533_s9 = smov 0  }
   0x3   :  { %s535_s10 = smov 0   ;;  %s537_s11 = smov 0  }
   0x4 LB: > { %s364_s12 = sadd.s32 4294967295, %s515_s11   ;;  %s26_s13 = sadd.s32 1, %s511_s10  ;;  %s515_s11 = sphi %s537_s11, %s14_s11   ;;  %s511_s10 = sphi %s535_s10, %s689_s10   ;;  %s507_s9 = sphi %s533_s9, %s688_s9   ;;  %s503_s8 = sphi %s531_s8, %s687_s8   ;;  %s499_s7 = sphi %s529_s7, %s686_s7   ;;  %s495_s6 = sphi %s527_s6, %s685_s6  }
   0x5   : > { %p28_p0 = scmp.ge.s32.totalorder %s26_s13, 2  ;;  %s35_s14 = sadd.s32 1, %s503_s8 }
   0x6   : > { %p42_p1 = scmp.ne.s32.totalorder %s503_s8, %s499_s7  ;;  %p43_p2 = scmp.eq.s32.totalorder %s515_s11, 0 }
   0x7   : > { %s691_s13 = smov (%p28_p0, %s26_s13), 0  ;;  %p48_p4 = scmp.ne.s32.totalorder %s499_s7, %s495_s6 }
   0x8   : > { %p563_p3 = por %p43_p2, %p42_p1  ;;  %s30_s16 = ssub.s32 %s511_s10, %s691_s13 }
   0x9   : > { %p49_p5 = scmp.eq.s32.totalorder %s364_s12, 0  ;;  %p33_p6 = scmp.eq.s32.totalorder %s30_s16, 0 }
   0xa   : > { %p385_p8 = scmp.lt.s32.totalorder %s515_s11, 2  ;;  %s100_s19 = sand.u32 1, %s503_s8  }
   0xb   : > { %p570_p7 = por %p49_p5, %p48_p4  ;;  %s377_s20 = sshll.u32 %s511_s10, 3 }
   0xc   : > { %s576_s18 = scalar_select %p33_p6, %s503_s8, %s35_s14  }
   0xd   : > { %s368_s21 = sshll.u32 %s100_s19, 3  ;;  %s111_s24 = scalar_lea.hbm %s681_s0, %s377_s20 }
   0xe   : > { %s113_s25 = sshll.u32 %s111_s24, 4  ;;  %s104_s26 = scalar_lea.vmem [#allocation2], %s368_s21  ;;  %s114_s25 = int_to_ptr.hbm [resolvable:$true] %s113_s25 }
   0xf   : > { %s115_s27 = sshll.u32 %s104_s26, 4  ;;  %p382_p9 = pnand %p385_p8, %p563_p3  ;;  %s116_s27 = int_to_ptr.vmem [resolvable:$true] %s115_s27 }
  0x10   : > { %p371_p10 = scmp.ge.s32.totalorder %s515_s11, 1  ;;  %p120_p11 = scmp.lt.s32.totalorder %s515_s11, 3 }
  0x11   : > { %s101_s28 = scalar_lea.sflag [#allocation3], %s100_s19 }
  0x12   : > { %384 = dma.hbm_to_vmem [thread:$0]  (!%p382_p9), %s114_s25, 128, %s116_s27, %s101_s28  }
  0x13   : > { %p121_p12 = pnand %p371_p10, %p120_p11 }
  0x14   : > { %s126_s29 = sand.u32 (!%p121_p12), 1, %s499_s7  }
  0x15   : > { %124 = sbr.rel (%p121_p12) target bundleno = 450 (0x1c2), region = 24  ;;  %s372_s30 = sshll.u32 (!%p121_p12), %s126_s29, 3 }
  0x16   : > { %s127_s2 = scalar_lea.sflag (!%p121_p12), [#allocation3], %s126_s29  ;;  %s130_s3 = scalar_lea.vmem (!%p121_p12), [#allocation2], %s372_s30 }
  0x1a   : > { %490 = dma.done.wait (%p570_p7), %s127_s2, 128  }
  0x1b   : > { %492 = vsyncadd (%p570_p7), %s127_s2, 4294967168  ;;  %v165_v0 = vld [vmem:[%s130_s3] sm:$0xff]  ;;  %p156_p13 = scmp.lt.s32.totalorder %s507_s9, 1  ;;  %vm236_vm0 = vcmask 31744  }
  0x1c   : > { %167 = vst [vmem:[#allocation1] ss:$2 sm:$0xff] %v165_v0 }
  0x1d   : > { %s693_s9 = smov (!%p156_p13, %s507_s9), 1 }
  0x1e   : > { %s378_s4 = sshll.u32 %s693_s9, 8 }
  0x1f   : > { %s597_s12 = scalar_lea.vmem %s682_s1, %s378_s4 }
  0x23   : > { %v168_v1 = vld.sshfl [vmem:[#allocation1] sm:$0xff pattern:$0x75316420]  ;;  %v169_v2 = vld.sshfl [vmem:[#allocation1 + $0x8] sm:$0xff pattern:$0x75316420] }
  0x24   : > { %172 = vxpose.xlu0.b32.start.end [1/1] (short) %v168_v1, 128 }
  0xa4   : > { %204 = vxpose.xlu0.b32.start.end [1/1] (short) %v169_v2, 128 }
  0xc8   : > { %v188_v3 = vpop.trf.xlu0 }
  0xc9   : > { %237 = vst.msk [vmem:[%s597_s12] sm:$0xff] %vm236_vm0, %v188_v3 }
  0xd0   : > { %v189_v4 = vpop.trf.xlu0 }
  0xd1   : > { %238 = vst.msk [vmem:[%s597_s12 + $0x8] sm:$0xff] %vm236_vm0, %v189_v4 }
  0xd8   : > { %v190_v5 = vpop.trf.xlu0 }
  0xd9   : > { %239 = vst.msk [vmem:[%s597_s12 + $0x10] sm:$0xff] %vm236_vm0, %v190_v5 }
  0xe0   : > { %v191_v6 = vpop.trf.xlu0 }
  0xe1   : > { %240 = vst.msk [vmem:[%s597_s12 + $0x18] sm:$0xff] %vm236_vm0, %v191_v6 }
  0xe8   : > { %v192_v7 = vpop.trf.xlu0 }
  0xe9   : > { %241 = vst.msk [vmem:[%s597_s12 + $0x20] sm:$0xff] %vm236_vm0, %v192_v7 }
  0xf0   : > { %v193_v8 = vpop.trf.xlu0 }
  0xf1   : > { %242 = vst.msk [vmem:[%s597_s12 + $0x28] sm:$0xff] %vm236_vm0, %v193_v8 }
  0xf8   : > { %v194_v9 = vpop.trf.xlu0 }
  0xf9   : > { %243 = vst.msk [vmem:[%s597_s12 + $0x30] sm:$0xff] %vm236_vm0, %v194_v9 }
 0x100   : > { %v195_v10 = vpop.trf.xlu0 }
 0x101   : > { %244 = vst.msk [vmem:[%s597_s12 + $0x38] sm:$0xff] %vm236_vm0, %v195_v10 }
 0x108   : > { %v196_v11 = vpop.trf.xlu0 }
 0x109   : > { %245 = vst.msk [vmem:[%s597_s12 + $0x40] sm:$0xff] %vm236_vm0, %v196_v11 }
 0x110   : > { %v197_v12 = vpop.trf.xlu0 }
 0x111   : > { %246 = vst.msk [vmem:[%s597_s12 + $0x48] sm:$0xff] %vm236_vm0, %v197_v12 }
 0x118   : > { %v198_v13 = vpop.trf.xlu0 }
 0x119   : > { %247 = vst.msk [vmem:[%s597_s12 + $0x50] sm:$0xff] %vm236_vm0, %v198_v13 }
 0x120   : > { %v199_v14 = vpop.trf.xlu0 }
 0x121   : > { %248 = vst.msk [vmem:[%s597_s12 + $0x58] sm:$0xff] %vm236_vm0, %v199_v14 }
 0x128   : > { %v200_v15 = vpop.trf.xlu0 }
 0x129   : > { %249 = vst.msk [vmem:[%s597_s12 + $0x60] sm:$0xff] %vm236_vm0, %v200_v15 }
 0x130   : > { %v201_v16 = vpop.trf.xlu0 }
 0x131   : > { %250 = vst.msk [vmem:[%s597_s12 + $0x68] sm:$0xff] %vm236_vm0, %v201_v16 }
 0x138   : > { %v202_v17 = vpop.trf.xlu0 }
 0x139   : > { %251 = vst.msk [vmem:[%s597_s12 + $0x70] sm:$0xff] %vm236_vm0, %v202_v17 }
 0x140   : > { %v203_v18 = vpop.trf.xlu0 }
 0x141   : > { %252 = vst.msk [vmem:[%s597_s12 + $0x78] sm:$0xff] %vm236_vm0, %v203_v18 }
 0x148   : > { %v220_v19 = vpop.trf.xlu0 }
 0x149   : > { %253 = vst.msk [vmem:[%s597_s12 + $0x80] sm:$0xff] %vm236_vm0, %v220_v19 }
 0x150   : > { %v221_v20 = vpop.trf.xlu0 }
 0x151   : > { %254 = vst.msk [vmem:[%s597_s12 + $0x88] sm:$0xff] %vm236_vm0, %v221_v20 }
 0x158   : > { %v222_v21 = vpop.trf.xlu0 }
 0x159   : > { %255 = vst.msk [vmem:[%s597_s12 + $0x90] sm:$0xff] %vm236_vm0, %v222_v21 }
 0x160   : > { %v223_v22 = vpop.trf.xlu0 }
 0x161   : > { %256 = vst.msk [vmem:[%s597_s12 + $0x98] sm:$0xff] %vm236_vm0, %v223_v22 }
 0x168   : > { %v224_v23 = vpop.trf.xlu0 }
 0x169   : > { %257 = vst.msk [vmem:[%s597_s12 + $0xa0] sm:$0xff] %vm236_vm0, %v224_v23 }
 0x170   : > { %v225_v24 = vpop.trf.xlu0 }
 0x171   : > { %258 = vst.msk [vmem:[%s597_s12 + $0xa8] sm:$0xff] %vm236_vm0, %v225_v24 }
 0x178   : > { %v226_v25 = vpop.trf.xlu0 }
 0x179   : > { %259 = vst.msk [vmem:[%s597_s12 + $0xb0] sm:$0xff] %vm236_vm0, %v226_v25 }
 0x180   : > { %v227_v26 = vpop.trf.xlu0 }
 0x181   : > { %260 = vst.msk [vmem:[%s597_s12 + $0xb8] sm:$0xff] %vm236_vm0, %v227_v26 }
 0x188   : > { %v228_v27 = vpop.trf.xlu0 }
 0x189   : > { %261 = vst.msk [vmem:[%s597_s12 + $0xc0] sm:$0xff] %vm236_vm0, %v228_v27 }
 0x190   : > { %v229_v28 = vpop.trf.xlu0 }
 0x191   : > { %262 = vst.msk [vmem:[%s597_s12 + $0xc8] sm:$0xff] %vm236_vm0, %v229_v28 }
 0x198   : > { %v230_v29 = vpop.trf.xlu0 }
 0x199   : > { %263 = vst.msk [vmem:[%s597_s12 + $0xd0] sm:$0xff] %vm236_vm0, %v230_v29 }
 0x1a0   : > { %v231_v30 = vpop.trf.xlu0 }
 0x1a1   : > { %264 = vst.msk [vmem:[%s597_s12 + $0xd8] sm:$0xff] %vm236_vm0, %v231_v30 }
 0x1a8   : > { %v232_v31 = vpop.trf.xlu0 }
 0x1a9   : > { %265 = vst.msk [vmem:[%s597_s12 + $0xe0] sm:$0xff] %vm236_vm0, %v232_v31 }
 0x1b0   : > { %v233_v32 = vpop.trf.xlu0 }
 0x1b1   : > { %266 = vst.msk [vmem:[%s597_s12 + $0xe8] sm:$0xff] %vm236_vm0, %v233_v32 }
 0x1b8   : > { %v234_v33 = vpop.trf.xlu0 }
 0x1b9   : > { %267 = vst.msk [vmem:[%s597_s12 + $0xf0] sm:$0xff] %vm236_vm0, %v234_v33 }
 0x1c0   : > { %v235_v34 = vpop.trf.xlu0 }
 0x1c1   : > { %268 = vst.msk [vmem:[%s597_s12 + $0xf8] sm:$0xff] %vm236_vm0, %v235_v34 }
 0x1c2 PF: > { %s14_s11 = sadd.s32 1, %s515_s11   ;;  %s685_s6 = smov %s499_s7 }
 0x1c3   : > { %p11_p0 = scmp.ge.s32.totalorder %s14_s11, 4   ;;  %s686_s7 = smov %s503_s8 }
 0x1c4   : > { %s687_s8 = smov %s576_s18  ;;  %s688_s9 = smov %s511_s10 }
 0x1c5   : > { %s689_s10 = smov %s691_s13  ;;  %13 = sbr.rel (!%p11_p0) target bundleno = 4 (0x4), region = 64 }
 0x1ca   :  { %299 = vsyncpa [#allocation3], 1 }
 0x1cb   :  { %301 = vsyncpa [#allocation3 + $0x1], 1 }

</bundles_post_ra>
